<compile_context>
chip_gen: v5e
topology: v5e:2x2
jax: 0.10.0
libtpu: 0.0.40
codegen_flags: <defaults>
</compile_context>

<pallas_src>
import functools

import jax
import jax.numpy as jnp
from jax.experimental import pallas as pl
from jax.experimental.pallas import tpu as pltpu


def _round_up(a, b):
    return ((a + b - 1) // b) * b


def _vmem_capacity_bytes():
    """Physical per-core VMEM; conservative (v7x, 64 MiB) fallback if query fails."""
    try:
        cap = int(pltpu.get_tpu_info().vmem_capacity_bytes)
        if cap > 0:
            return cap
    except Exception:
        pass
    return 64 << 20


# --------------------------------------------------------------------------
# Kernels
# --------------------------------------------------------------------------
def _fused_kernel(x_ref, w1t_ref, w2t_ref, o_ref, *, inv_hw):
    """Single-pass cSE for one sample resident in VMEM.

    x_ref:   (1, C, HW)  one sample, lane-dense spatial axis
    w1t_ref: (C, Cs)     squeeze weight, pre-transposed, f32
    w2t_ref: (Cs, C)     excitation weight, pre-transposed, f32
    o_ref:   (1, C, HW)
    """
    x = x_ref[...]
    zsum = jnp.sum(x.astype(jnp.float32), axis=-1)                     # (1, C)
    z = zsum * inv_hw                                                  # mean
    z1 = jnp.dot(z, w1t_ref[...], preferred_element_type=jnp.float32)  # (1, Cs)
    z2 = jnp.dot(z1, w2t_ref[...], preferred_element_type=jnp.float32) # (1, C)
    s = jax.nn.sigmoid(z2).astype(x.dtype)                             # (1, C)
    # One-time lanes->sublanes relayout of the tiny gate, then a pure
    # lane-broadcast multiply over the whole resident sample (native dtype).
    o_ref[...] = (x * s[:, :, None]).astype(o_ref.dtype)


def _pool_kernel(x_ref, zsum_ref):
    """Accumulate per-channel spatial sums for one (sample, spatial-tile) block.

    x_ref:    (1, C, T)   lane-dense spatial tile of one sample
    zsum_ref: (1, 1, C)   per-sample channel sums, resident across the tile axis
    """
    t = pl.program_id(1)

    @pl.when(t == 0)
    def _():
        zsum_ref[...] = jnp.zeros_like(zsum_ref)

    # f32 accumulation even for bf16 inputs; the per-tile XLU reduce stays
    # hidden under the tile DMA on all generations at these tile sizes.
    part = jnp.sum(x_ref[...].astype(jnp.float32), axis=-1)            # (1, C)
    zsum_ref[...] += part[:, None, :]


def _scale_kernel(s_ref, x_ref, o_ref):
    """out = x * gate.

    s_ref: (1, C, 1)   gate in x.dtype, channels on sublanes -> lane broadcast
    x_ref: (1, C, T)   spatial tile
    o_ref: (1, C, T)
    """
    o_ref[...] = (x_ref[...] * s_ref[...]).astype(o_ref.dtype)


# --------------------------------------------------------------------------
# Wrapper
# --------------------------------------------------------------------------
def cse_forward(x, w_squeeze, w_excite, *, force_tiled=False):
    """x: (N, C, H, W); w_squeeze: (C//2, C); w_excite: (C, C//2)."""
    N, C, H, W = x.shape
    Cs = w_squeeze.shape[0]
    HW = H * W
    itemsize = jnp.dtype(x.dtype).itemsize
    inv_hw = 1.0 / float(HW)

    vmem_cap = _vmem_capacity_bytes()
    pipeline_budget = (vmem_cap * 7) // 10          # headroom under physical

    # 1x1 conv weights as pre-transposed f32 matrices (tiny).
    w1t = jnp.transpose(w_squeeze).astype(jnp.float32)   # (C, Cs)
    w2t = jnp.transpose(w_excite).astype(jnp.float32)    # (Cs, C)

    xf = x.reshape(N, C, HW)                        # lane-dense spatial axis

    # ---- Fused single-pass path -------------------------------------------
    sample_bytes = C * HW * itemsize
    w_bytes = 2 * C * Cs * 4
    fused_need = 4 * sample_bytes + w_bytes + (2 << 20)   # 2x dbl-buffered I/O
    if (not force_tiled) and fused_need <= pipeline_budget:
        out = pl.pallas_call(
            functools.partial(_fused_kernel, inv_hw=inv_hw),
            out_shape=jax.ShapeDtypeStruct((N, C, HW), x.dtype),
            grid_spec=pltpu.PrefetchScalarGridSpec(
                num_scalar_prefetch=0,
                grid=(N,),
                in_specs=[
                    pl.BlockSpec((1, C, HW), lambda n: (n, 0, 0)),
                    pl.BlockSpec((C, Cs), lambda n: (0, 0)),
                    pl.BlockSpec((Cs, C), lambda n: (0, 0)),
                ],
                out_specs=pl.BlockSpec((1, C, HW), lambda n: (n, 0, 0)),
            ),
            compiler_params=pltpu.CompilerParams(
                dimension_semantics=("parallel",),
                vmem_limit_bytes=int(min(pipeline_budget,
                                         max(16 << 20, fused_need))),
            ),
            cost_estimate=pl.CostEstimate(
                flops=2 * N * C * HW + 4 * N * C * Cs,
                transcendentals=N * C,
                bytes_accessed=2 * N * C * HW * itemsize + w_bytes,
            ),
        )(xf, w1t, w2t)
        return out.reshape(N, C, H, W)

    # ---- Tiled fallback (one sample does not fit VMEM) ----------------------
    # Tile budget by generation: ~4 MiB tiles on 64 MiB VMEM (v7x), ~12 MiB on
    # 128 MiB VMEM (v5e/v6e), to amortize the ~0.35 us per-grid-step overhead.
    tile_budget = (4 << 20) if vmem_cap <= (64 << 20) else (12 << 20)
    row_bytes = C * itemsize
    T = max(128, (tile_budget // max(1, row_bytes)) // 128 * 128)
    T = min(T, _round_up(HW, 128))
    HWp = _round_up(HW, T)
    nt = HWp // T
    blk_bytes = C * T * itemsize
    vmem_limit = int(min(pipeline_budget,
                         max(16 << 20, 5 * blk_bytes + (4 << 20))))

    if HWp != HW:
        # Zero-pad the spatial axis: sum-safe for the pool, sliced off at the
        # end.  Costs one extra copy of x but keeps every block lane-dense and
        # bounded by the VMEM budget on all generations (no full-HW fallback).
        xf = jnp.pad(xf, ((0, 0), (0, 0), (0, HWp - HW)))

    # Phase 1: per-sample channel sums, accumulated over spatial tiles.
    zsum = pl.pallas_call(
        _pool_kernel,
        out_shape=jax.ShapeDtypeStruct((N, 1, C), jnp.float32),
        grid_spec=pltpu.PrefetchScalarGridSpec(
            num_scalar_prefetch=0,
            grid=(N, nt),
            in_specs=[pl.BlockSpec((1, C, T), lambda n, t: (n, 0, t))],
            out_specs=pl.BlockSpec((1, 1, C), lambda n, t: (n, 0, 0)),
        ),
        compiler_params=pltpu.CompilerParams(
            dimension_semantics=("parallel", "arbitrary"),
            vmem_limit_bytes=vmem_limit,
        ),
        cost_estimate=pl.CostEstimate(
            flops=N * C * HWp,
            transcendentals=0,
            bytes_accessed=N * C * HWp * itemsize + N * C * 4,
        ),
    )(xf)

    # Gate: microscopic matmuls + sigmoid in plain jnp (no dedicated
    # pallas_call for an MXU-starved (N,C)@(C,Cs)).  Output laid out (N, C, 1)
    # so the scale kernel's multiply needs no per-tile cross-lane relayout.
    z = zsum[:, 0, :] * inv_hw                               # (N, C) f32 mean
    s = jax.nn.sigmoid((z @ w1t) @ w2t)                      # (N, C) f32
    gate = s.astype(x.dtype)[:, :, None]                     # (N, C, 1)

    # Phase 3: broadcast multiply over lane-dense spatial tiles.
    out = pl.pallas_call(
        _scale_kernel,
        out_shape=jax.ShapeDtypeStruct((N, C, HWp), x.dtype),
        grid_spec=pltpu.PrefetchScalarGridSpec(
            num_scalar_prefetch=0,
            grid=(N, nt),
            in_specs=[
                pl.BlockSpec((1, C, 1), lambda n, t: (n, 0, 0)),
                pl.BlockSpec((1, C, T), lambda n, t: (n, 0, t)),
            ],
            out_specs=pl.BlockSpec((1, C, T), lambda n, t: (n, 0, t)),
        ),
        compiler_params=pltpu.CompilerParams(
            dimension_semantics=("parallel", "parallel"),
            vmem_limit_bytes=vmem_limit,
        ),
        cost_estimate=pl.CostEstimate(
            flops=N * C * HWp,
            transcendentals=0,
            bytes_accessed=2 * N * C * HWp * itemsize,
        ),
    )(gate, xf)

    if HWp != HW:
        out = out[:, :, :HW]
    return out.reshape(N, C, H, W)


# --------------------------------------------------------------------------
# Reference + demo
# --------------------------------------------------------------------------
def cse_reference(x, w_squeeze, w_excite):
    z = jnp.mean(x.astype(jnp.float32), axis=(2, 3))  # (N, C)
    z1 = z @ w_squeeze.T                              # (N, C//2)
    z2 = z1 @ w_excite.T                              # (N, C)
    s = jax.nn.sigmoid(z2).astype(x.dtype)
    return (x * s[:, :, None, None]).astype(x.dtype)


if __name__ == "__main__":
    key = jax.random.PRNGKey(0)
    k_x, k_w1, k_w2 = jax.random.split(key, 3)

    N, C, H, W = 2, 4, 16, 16
    Cs = C // 2

    x = jax.random.normal(k_x, (N, C, H, W), dtype=jnp.float32)
    # Conv2d weights are (out_ch, in_ch, 1, 1); 1x1 kernels squeeze to 2-D.
    w_squeeze = jax.random.normal(k_w1, (Cs, C), dtype=jnp.float32) * 0.1
    w_excite = jax.random.normal(k_w2, (C, Cs), dtype=jnp.float32) * 0.1

    # Fused single-pass path (sample fits VMEM).
    ref = cse_reference(x, w_squeeze, w_excite)
    out = jax.block_until_ready(cse_forward(x, w_squeeze, w_excite))
    assert out.shape == (N, C, H, W)
    assert jnp.allclose(out, ref, atol=1e-5, rtol=1e-5)

    # Tiled fallback path (also exercises zero-padding of a non-multiple-of-128
    # spatial extent and the jnp gate between the two pallas_calls).
    x2 = jax.random.normal(k_x, (N, C, 15, 15), dtype=jnp.float32)
    ref2 = cse_reference(x2, w_squeeze, w_excite)
    out2 = jax.block_until_ready(
        cse_forward(x2, w_squeeze, w_excite, force_tiled=True))
    assert out2.shape == (N, C, 15, 15)
    assert jnp.allclose(out2, ref2, atol=1e-5, rtol=1e-5)

    print("KERNEL_OK")
</pallas_src>

<mosaic_0001>
module attributes {stable_mosaic.version = 11 : i64} {
  func.func @_fused_kernel(%arg0: i32, %arg1: memref<1x4x256xf32, #tpu.memory_space<vmem>>, %arg2: memref<4x2xf32, #tpu.memory_space<vmem>>, %arg3: memref<2x4xf32, #tpu.memory_space<vmem>>, %arg4: memref<1x4x256xf32, #tpu.memory_space<vmem>>) attributes {dimension_semantics = [#tpu.dimension_semantics<parallel>], iteration_bounds = array<i64: 2>, scalar_prefetch = 0 : i64, scratch_operands = 0 : i64, tpu.core_type = #tpu.core_type<tc>, window_params = [{transform_indices = @transform_0, window_bounds = array<i64: 1, 4, 256>}, {pipeline_mode = #tpu.pipeline_mode<synchronous>, transform_indices = @transform_1, window_bounds = array<i64: 4, 2>}, {pipeline_mode = #tpu.pipeline_mode<synchronous>, transform_indices = @transform_2, window_bounds = array<i64: 2, 4>}, {transform_indices = @transform_3, window_bounds = array<i64: 1, 4, 256>}]} {
    %c0 = arith.constant 0 : index
    %c0_0 = arith.constant 0 : index
    %c0_1 = arith.constant 0 : index
    %0 = vector.load %arg1[%c0, %c0_0, %c0_1] : memref<1x4x256xf32, #tpu.memory_space<vmem>>, vector<1x4x256xf32>
    %cst = arith.constant dense<0.000000e+00> : vector<1x4xf32>
    %1 = vector.multi_reduction <add>, %0, %cst [2] : vector<1x4x256xf32> to vector<1x4xf32>
    %cst_2 = arith.constant 3.906250e-03 : f32
    %2 = vector.broadcast %cst_2 : f32 to vector<1x4xf32>
    %3 = arith.mulf %1, %2 : vector<1x4xf32>
    %c0_3 = arith.constant 0 : index
    %c0_4 = arith.constant 0 : index
    %4 = vector.load %arg2[%c0_3, %c0_4] : memref<4x2xf32, #tpu.memory_space<vmem>>, vector<4x2xf32>
    %cst_5 = arith.constant dense<0.000000e+00> : vector<1x2xf32>
    %5 = tpu.matmul %3, %4, %cst_5 {dimension_numbers = #tpu.dot_dimension_numbers<[1], [0], [0], [1], [0, 0, 1, 1], [], []>} : vector<1x4xf32>, vector<4x2xf32>, vector<1x2xf32> -> vector<1x2xf32>
    %c0_6 = arith.constant 0 : index
    %c0_7 = arith.constant 0 : index
    %6 = vector.load %arg3[%c0_6, %c0_7] : memref<2x4xf32, #tpu.memory_space<vmem>>, vector<2x4xf32>
    %cst_8 = arith.constant dense<0.000000e+00> : vector<1x4xf32>
    %7 = tpu.matmul %5, %6, %cst_8 {dimension_numbers = #tpu.dot_dimension_numbers<[1], [0], [0], [1], [0, 0, 1, 1], [], []>} : vector<1x2xf32>, vector<2x4xf32>, vector<1x4xf32> -> vector<1x4xf32>
    %8 = arith.negf %7 : vector<1x4xf32>
    %9 = math.exp %8 : vector<1x4xf32>
    %cst_9 = arith.constant 1.000000e+00 : f32
    %10 = vector.broadcast %cst_9 : f32 to vector<1x4xf32>
    %11 = arith.addf %10, %9 : vector<1x4xf32>
    %12 = arith.divf %10, %11 : vector<1x4xf32>
    %13 = vector.shape_cast %12 : vector<1x4xf32> to vector<1x4x1xf32>
    %14 = vector.broadcast %13 : vector<1x4x1xf32> to vector<1x4x256xf32>
    %15 = arith.mulf %0, %14 : vector<1x4x256xf32>
    %c0_10 = arith.constant 0 : index
    %c0_11 = arith.constant 0 : index
    %c0_12 = arith.constant 0 : index
    %16 = vector.load %arg4[%c0_10, %c0_11, %c0_12] : memref<1x4x256xf32, #tpu.memory_space<vmem>>, vector<1x4x256xf32>
    tpu.vector_store %arg4[%c0_10, %c0_11, %c0_12], %15 {strides = array<i32>} : memref<1x4x256xf32, #tpu.memory_space<vmem>>, vector<1x4x256xf32>,
    return
  }
  func.func @transform_0(%arg0: i32) -> (i32, i32, i32) {
    %c0_i32 = arith.constant 0 : i32
    %c0_i32_0 = arith.constant 0 : i32
    %c0_i32_1 = arith.constant 0 : i32
    return %arg0, %c0_i32, %c0_i32_0 : i32, i32, i32
  }
  func.func @transform_1(%arg0: i32) -> (i32, i32) {
    %c0_i32 = arith.constant 0 : i32
    %c0_i32_0 = arith.constant 0 : i32
    %c0_i32_1 = arith.constant 0 : i32
    return %c0_i32, %c0_i32_0 : i32, i32
  }
  func.func @transform_2(%arg0: i32) -> (i32, i32) {
    %c0_i32 = arith.constant 0 : i32
    %c0_i32_0 = arith.constant 0 : i32
    %c0_i32_1 = arith.constant 0 : i32
    return %c0_i32, %c0_i32_0 : i32, i32
  }
  func.func @transform_3(%arg0: i32) -> (i32, i32, i32) {
    %c0_i32 = arith.constant 0 : i32
    %c0_i32_0 = arith.constant 0 : i32
    %c0_i32_1 = arith.constant 0 : i32
    return %arg0, %c0_i32, %c0_i32_0 : i32, i32, i32
  }
}

</mosaic_0001>

<bundles_post_ra>
// kernel: tpu_custom_call.1
= control target key start
LH: loop header
LB: loop body
LE: loop exit
PB: predicated region body
PF: predicated region fallthrough
CT: control target
= control target key end

     0   :  { %8 = vsyncpa [#allocation3], 0  ;;  %s713_s0 = inlined_call_operand.hbm [shape: f32[2,4,256], index: 0, kind: input, shape index: {}]   ;;  %s714_s1 = inlined_call_operand.vmem [shape: f32[4,2], index: 1, kind: input, shape index: {}]   ;;  %s715_s2 = inlined_call_operand.vmem [shape: f32[2,4], index: 2, kind: input, shape index: {}]   ;;  %s716_s3 = inlined_call_operand.hbm [shape: f32[2,4,256], index: 3, kind: output, shape index: {}]  }
   0x1   :  { %10 = vsyncpa [#allocation3 + $0x1], 0 }
   0x2   :  { %11 = vsyncpa [#allocation4], 0 }
   0x3   :  { %13 = vsyncpa [#allocation4 + $0x1], 0  ;;  %s576_s12 = smov 0   ;;  %s578_s13 = smov 0  }
   0x4   :  { %s580_s14 = smov 0   ;;  %s582_s15 = smov 0  }
   0x5 LB: > { %s597_s16 = sadd.s32 4294967295, %s553_s15   ;;  %s384_s17 = sadd.s32 4294967294, %s553_s15   ;;  %s553_s15 = sphi %s582_s15, %s726_s15   ;;  %s549_s14 = sphi %s580_s14, %s725_s14   ;;  %s545_s13 = sphi %s578_s13, %s724_s13   ;;  %s541_s12 = sphi %s576_s12, %s723_s12  }
   0x6   : > { %s601_s18 = sadd.s32 1, %s553_s15   ;;  %s26_s19 = sadd.s32 1, %s549_s14 }
   0x7   : > { %s23_s20 = ssub.s32 %s553_s15, %s601_s18  ;;  %p33_p0 = scmp.ne.s32.totalorder %s549_s14, %s545_s13 }
   0x8   : > { %p24_p1 = scmp.eq.s32.totalorder %s23_s20, 0  ;;  %p34_p2 = scmp.eq.s32.totalorder %s553_s15, 0 }
   0x9   : > { %p39_p3 = scmp.ne.s32.totalorder %s545_s13, %s541_s12  ;;  %p40_p4 = scmp.eq.s32.totalorder %s597_s16, 0 }
   0xa   : > { %s613_s21 = scalar_select %p24_p1, %s549_s14, %s26_s19  }
   0xb   : > { %p615_p5 = por %p34_p2, %p33_p0  ;;  %p619_p6 = por %p40_p4, %p39_p3 }
   0xc   : > { %p105_p7 = scmp.eq.s32.totalorder %s597_s16, 1  ;;  %p111_p8 = scmp.eq.s32.totalorder %s384_s17, 1 }
   0xd   : > { %p417_p10 = scmp.lt.s32.totalorder %s553_s15, 2  ;;  %s137_s26 = sand.u32 1, %s549_s14  }
   0xe   : > { %p626_p11 = por %p105_p7, %p33_p0  ;;  %p630_p12 = por %p111_p8, %p39_p3 }
   0xf   : > { %s403_s27 = sshll.u32 %s553_s15, 3  ;;  %s387_s28 = sshll.u32 %s137_s26, 3 }
  0x10   : > { %s146_s4 = scalar_lea.hbm %s713_s0, %s403_s27  ;;  %s141_s6 = scalar_lea.vmem [#allocation2], %s387_s28 }
  0x11   : > { %s148_s5 = sshll.u32 %s146_s4, 4  ;;  %s150_s7 = sshll.u32 %s141_s6, 4  ;;  %s149_s5 = int_to_ptr.hbm [resolvable:$true] %s148_s5  ;;  %s151_s7 = int_to_ptr.vmem [resolvable:$true] %s150_s7 }
  0x12   : > { %p641_p13 = pnand %p417_p10, %p615_p5  ;;  %p390_p0 = scmp.ge.s32.totalorder %s553_s15, 1 }
  0x13   : > { %p155_p1 = scmp.lt.s32.totalorder %s553_s15, 3  ;;  %s138_s9 = scalar_lea.sflag [#allocation3], %s137_s26 }
  0x14   : > { %s457_s10 = sshra.s32 %s149_s5, 4  ;;  %p461_p3 = pneg %p641_p13  ;;  %s458_s10 = int_to_ptr.hbm [resolvable:$true] %s457_s10 }
  0x15   : > { %s459_s11 = scalar_lea.hbm %s458_s10, 8  ;;  %s464_s20 = scalar_lea.hbm %s713_s0, 16 }
  0x16   : > { %p460_p2 = scmp.ne.s32.totalorder %s458_s10, %s459_s11  ;;  %p465_p5 = scmp.lt.s32.totalorder %s458_s10, %s713_s0 }
  0x17   : > { %p466_p8 = scmp.lt.s32.totalorder %s464_s20, %s459_s11 }
  0x18   : > { %p462_p4 = pnand %p461_p3, %p460_p2 }
  0x19   : > { %p467_p10 = por %p466_p8, %p465_p5 }
  0x1a   : > { %p463_p7 = pneg %p462_p4 }
  0x1c   : > { %p468_p9 = pnand %p467_p10, %p463_p7 }
  0x1e   : > { %471 = shalt.err (!%p468_p9)
}
  0x1f   : > { %412 = dma.hbm_to_vmem [thread:$0]  (!%p641_p13), %s149_s5, 128, %s151_s7, %s138_s9  }
  0x20   : > { %p156_p2 = pnand %p390_p0, %p155_p1 }
  0x21   : > { %s662_s26 = sand.u32 (!%p156_p2), 1, %s545_s13  }
  0x22   : > { %159 = sbr.rel (%p156_p2) target bundleno = 576 (0x240), region = 32  ;;  %s391_s28 = sshll.u32 (!%p156_p2), %s662_s26, 3 }
  0x23   : > { %s162_s29 = scalar_lea.sflag (!%p156_p2), [#allocation3], %s662_s26  ;;  %s165_s30 = scalar_lea.vmem (!%p156_p2), [#allocation2], %s391_s28 }
  0x27   : > { %532 = dma.done.wait (%p619_p6), %s162_s29, 128  }
  0x28   : > { %534 = vsyncadd (%p619_p6), %s162_s29, 4294967168  ;;  %v189_v0 = vld [vmem:[%s165_s30] sm:$0xff]  ;;  %vm196_vm0 = vcmask 1043456   ;;  %v203_v6 = vld [vmem:[%s714_s1] sm:$0xf]  ;;  %v205_v7 = vlaneseq  ;;  %vm208_vm1 = vcmask 31744  }
  0x29   : > { %191 = vst [vmem:[#allocation1] ss:$2 sm:$0xff] %v189_v0  ;;  %393 = vmatpush.msk.msra.mxu0 %vm196_vm0, %v203_v6  ;;  %v234_v12 = vld [vmem:[%s715_s2] sm:$0x3]  ;;  %vm239_vm2 = vcmask 1041408   ;;  %vm235_vm3 = vcmask 15360  }
  0x2a   : > { %v206_v8 = vand.u32 127, %v205_v7  ;;  %395 = vmatpush.msk.msra.mxu1 %vm239_vm2, %v234_v12  ;;  %v284_v14 = vshrl.u32 %v205_v7, 7  ;;  %v555_v30 = vmov 839922192   ;;  %s404_s7 = sshll.u32 %s597_s16, 3  ;;  %s188_s11 = scalar_lea.vmem [#allocation5], %s391_s28 }
  0x2b   : > { %v291_v31 = vunpack.c.l.s4 %v555_v30  ;;  %s309_s10 = scalar_lea.hbm %s716_s3, %s404_s7  ;;  %s311_s17 = sshll.u32 %s188_s11, 4  ;;  %s312_s17 = int_to_ptr.vmem [resolvable:$true] %s311_s17 }
  0x2c   : > { %452 = vset.pattern.permute.xlu0 %v284_v14  ;;  %s313_s19 = sshll.u32 %s309_s10, 4  ;;  %s298_s20 = scalar_lea.sflag [#allocation4], %s662_s26  ;;  %s314_s19 = int_to_ptr.hbm [resolvable:$true] %s313_s19 }
  0x2d   : > { %v292_v32 = vunpack.c.0.s8 %v291_v31  ;;  %s501_s22 = sshra.s32 %s314_s19, 4  ;;  %s507_s30 = scalar_lea.hbm %s716_s3, 16  ;;  %s502_s22 = int_to_ptr.hbm [resolvable:$true] %s501_s22 }
  0x2e   : > { %s503_s16 = scalar_lea.hbm %s502_s22, 8  ;;  %p508_p0 = scmp.lt.s32.totalorder %s502_s22, %s716_s3 }
  0x2f   : > { %p504_p6 = scmp.ne.s32.totalorder %s502_s22, %s503_s16  ;;  %p509_p1 = scmp.lt.s32.totalorder %s507_s30, %s503_s16 }
  0x30   : > { %v192_v1 = vld.sshfl [vmem:[#allocation1] sm:$0xff pattern:$0x75316420]  ;;  %v193_v2 = vld.sshfl [vmem:[#allocation1 + $0x8] sm:$0xff pattern:$0x75316420] }
  0x31   : > { %v197_v3 = vsel %vm196_vm0, %v192_v1, 0.0  ;;  %v198_v4 = vsel %vm196_vm0, %v193_v2, 0.0  ;;  %p505_p9 = pnand %p504_p6, %p626_p11  ;;  %p510_p3 = por %p509_p1, %p508_p0 }
  0x32   : > { %v199_v5 = vadd.f32 %v198_v4, %v197_v3 }
  0x33   : > { %p506_p13 = pneg %p505_p9 }
  0x34   : > { %200 = vadd.xlane.f32.xlu0 %v199_v5 }
  0x35   : > { %p511_p4 = pnand %p510_p3, %p506_p13 }
  0xa7   : > { %v201_v9 = vpop.xlane.xlu0 %200 }
  0xa8   : > { %v202_v10 = vmul.f32 0.00390625, %v201_v9 }
  0xaa   : > { %v207_v11 = vperm.slane %v202_v10, %v206_v8 }
  0xac   : > { %394 = vmatmul.msk.f32.vlgmr.msra.gmra.mxu0 %vm208_vm1, %v207_v11 }
 0x129   : > { %v231_v13 = vpop.f32.mrf.mxu0 }
 0x12a   : > { %396 = vmatmul.msk.f32.vlgmr.msra.gmra.mxu1 %vm235_vm3, %v231_v13 }
 0x1a7   : > { %v260_v15 = vpop.f32.mrf.mxu1 }
 0x1a8   : > { %v397_v16 = vmul.f32 -1.442695, %v260_v15 }
 0x1aa   : > { %453 = vpow2.f32 %v397_v16 }
 0x1b0   : > { %v454_v17 = vpop.eup %453 }
 0x1b1   : > { %v266_v18 = vadd.f32 1.0, %v454_v17 }
 0x1b3   : > { %455 = vrcp.f32 %v266_v18  ;;  %v278_v22 = vand.u32 2147483648, %v266_v18  ;;  %v276_v24 = vand.u32 2147483647, %v266_v18  ;;  %vm272_vm5 = vweird.f32 %v266_v18 }
 0x1b5   : > { %v279_v26 = vor.u32 1.1754944e-38, %v278_v22  ;;  %vm277_vm7 = vcmp.eq.f32.partialorder %v276_v24, 8.507059e+37 }
 0x1b9   : > { %v456_v19 = vpop.eup %455 }
 0x1ba   : > { %v268_v20 = vmul.f32 %v456_v19, %v266_v18  ;;  %vm273_vm4 = vweird.f32 %v456_v19 }
 0x1bb   : > { %vm274_vm6 = vmor %vm272_vm5, %vm273_vm4 }
 0x1bc   : > { %v269_v21 = vsub.f32 1.0, %v268_v20 }
 0x1be   : > { %v270_v23 = vmul.f32 %v456_v19, %v269_v21 }
 0x1c0   : > { %v271_v25 = vadd.f32 %v456_v19, %v270_v23 }
 0x1c2   : > { %v275_v27 = vsel %vm274_vm6, %v456_v19, %v271_v25 }
 0x1c3   : > { %v280_v28 = vsel %vm277_vm7, %v279_v26, %v275_v27 }
 0x1c4   : > { %v282_v29 = vperm.slane %v280_v28, 0 }
 0x1c6   : > { %287 = vperm.xlu0 %452, %v282_v29  }
 0x238   : > { %v288_v33 = vpop.permute.xlu0 %287 }
 0x239   : > { %v293_v34 = vperm.slane %v288_v33, %v292_v32 }
 0x23b   : > { %v295_v35 = vmul.f32 %v293_v34, %v189_v0 }
 0x23d   : > { %296 = vst [vmem:[%s188_s11] sm:$0xff] %v295_v35 }
 0x23e   : > { %514 = shalt.err (!%p511_p4)
}
 0x23f   : > { %407 = dma.vmem_to_hbm [thread:$0]  (%p626_p11), %s312_s17, 128, %s314_s19, %s298_s20  }
 0x240 PF: > { %s325_s26 = sand.u32 1, %s541_s12   ;;  %p722_p7 = scmp.ge.s32.totalorder %s553_s15, 2 }
 0x241   : > { %s326_s5 = scalar_lea.sflag [#allocation4], %s325_s26 }
 0x242   : > { %p414_p5 = pnand %p722_p7, %p630_p12 }
 0x244   : > { %p415_p8 = pneg %p414_p5 }
 0x246   : > { %536 = dma.done.wait (%p415_p8), %s326_s5, 128  }
 0x247   : > { %538 = vsyncadd (%p415_p8), %s326_s5, 4294967168  ;;  %p16_p10 = scmp.ge.s32.totalorder %s601_s18, 4   ;;  %s723_s12 = smov %s545_s13 }
 0x248   : > { %s724_s13 = smov %s549_s14  ;;  %s725_s14 = smov %s613_s21 }
 0x249   : > { %s726_s15 = smov %s601_s18  ;;  %18 = sbr.rel (!%p16_p10) target bundleno = 5 (0x5), region = 77 }
 0x24e   :  { %332 = vsyncpa [#allocation3], 1 }
 0x24f   :  { %334 = vsyncpa [#allocation3 + $0x1], 1 }
 0x250   :  { %335 = vsyncpa [#allocation4], 1 }
 0x251   :  { %337 = vsyncpa [#allocation4 + $0x1], 1 }

</bundles_post_ra>
